<compile_context>
chip_gen: v7x
topology: tpu7x:2x2x1
jax: 0.10.0
libtpu: 0.0.40
codegen_flags: <defaults>
</compile_context>

<pallas_src>
import jax
import jax.numpy as jnp
from jax.experimental import pallas as pl
from jax.experimental.pallas import tpu as pltpu


def _round_up(x, m):
    return (x + m - 1) // m * m


def _tpu_vmem_capacity_bytes():
    """Physical VMEM per core; conservative 64 MiB fallback if the query fails."""
    try:
        return int(pltpu.get_tpu_info().vmem_capacity_bytes)
    except Exception:
        return 64 * 1024 * 1024


# --------------------------------------------------------------------------- #
# Kernels
# --------------------------------------------------------------------------- #
def _conv_transform_kernel(x_ref, w1_ref, b1_ref, w2_ref, b2_ref, o_ref):
    # x:(tm,in)  w1:(in,hid)  b1:(1,hid) f32  w2:(hid,out)  b2:(1,out) f32  o:(tm,out)
    h = jnp.dot(x_ref[...], w1_ref[...], preferred_element_type=jnp.float32)
    h = jnp.maximum(h + b1_ref[...], 0.0)                 # bias + ReLU in f32
    y = jnp.dot(h.astype(w2_ref.dtype), w2_ref[...],
                preferred_element_type=jnp.float32)
    o_ref[...] = (y + b2_ref[...]).astype(o_ref.dtype)


def _conv_transform_kstream_kernel(x_ref, w1_ref, b1_ref, w2_ref, b2_ref,
                                   o_ref, acc_ref):
    # Hidden-streaming variant: grid = (row_tiles, hidden_tiles), k innermost.
    # acc (tm, out) f32 accumulates y = sum_k relu(x @ W1_k + b1_k) @ W2_k (+ b2).
    k = pl.program_id(1)

    @pl.when(k == 0)
    def _init():
        acc_ref[...] = jnp.broadcast_to(b2_ref[...], acc_ref.shape)

    h = jnp.dot(x_ref[...], w1_ref[...], preferred_element_type=jnp.float32)
    h = jnp.maximum(h + b1_ref[...], 0.0)
    acc_ref[...] += jnp.dot(h.astype(w2_ref.dtype), w2_ref[...],
                            preferred_element_type=jnp.float32)

    @pl.when(k == pl.num_programs(1) - 1)
    def _store():
        o_ref[...] = acc_ref[...].astype(o_ref.dtype)


# --------------------------------------------------------------------------- #
# Wrapper
# --------------------------------------------------------------------------- #
def conv_transform(x, w1, b1, w2, b2, *, tm=None, hidden_block=None,
                   compute_dtype=None):
    """Fused ConvTransform forward.

    x:  (B, S, in_dim) or (B, in_dim)
    w1: (in_dim, hidden)   b1: (hidden,)
    w2: (hidden, out_dim)  b2: (out_dim,)
    compute_dtype: e.g. jnp.bfloat16 for the MXU fast path (output keeps x.dtype).
    hidden_block:  force the hidden-streaming (K-tiled accumulator) path.
    Returns (B, S, out_dim) or (B, out_dim).
    """
    orig_ndim = x.ndim
    if orig_ndim == 3:
        B, S, in_dim = x.shape
        x2d = x.reshape(B * S, in_dim)
    elif orig_ndim == 2:
        B, in_dim = x.shape
        x2d = x
    else:
        raise ValueError("ConvTransform expects 2-D or 3-D input")

    M = x2d.shape[0]
    hidden = w1.shape[1]
    out_dim = w2.shape[1]
    out_dtype = x.dtype

    # ---- compute dtype (bf16 MXU path on v6e/v7x when requested) -------------
    cdtype = jnp.dtype(compute_dtype) if compute_dtype is not None else jnp.dtype(x.dtype)
    x2d = x2d.astype(cdtype)
    w1c = w1.astype(cdtype)
    w2c = w2.astype(cdtype)
    # Biases pre-cast to f32, shaped (1, D): bias-add + ReLU stay f32 in-kernel.
    b1f = b1.astype(jnp.float32).reshape(1, hidden)
    b2f = b2.astype(jnp.float32).reshape(1, out_dim)

    cdsize = cdtype.itemsize
    odsize = jnp.dtype(out_dtype).itemsize

    # ---- generation-aware VMEM budget ----------------------------------------
    vmem_cap = _tpu_vmem_capacity_bytes()
    vmem_budget = vmem_cap - max(8 * 1024 * 1024, vmem_cap // 8)   # 112 MiB / 56 MiB
    tm_cap = 4096 if vmem_budget >= 96 * 1024 * 1024 else 2048

    # On-chip (VMEM) widths: lane dim is laid out in 128-wide tiles regardless of
    # the HBM shape, so account for that when sizing tiles (HBM traffic is real-width).
    in_v = _round_up(in_dim, 128)
    hid_v = _round_up(hidden, 128)
    out_v = _round_up(out_dim, 128)

    row_align = 8 * max(1, 4 // cdsize)          # f32: 8 rows/vreg, bf16: 16

    # Resident (single-buffered) weights + f32 biases for the fused path.
    w_bytes = (in_v * hid_v + hid_v * out_v) * cdsize + (hid_v + out_v) * 4
    per_row_fused = 2 * in_v * cdsize + 2 * out_v * odsize + (hid_v + out_v) * 4
    tm_fit_fused = (vmem_budget - w_bytes) // per_row_fused if w_bytes < vmem_budget else 0

    use_streaming = (hidden_block is not None
                     or w_bytes > vmem_budget // 2
                     or tm_fit_fused < row_align)

    common_flops = 2 * M * in_dim * hidden + 2 * M * hidden * out_dim

    if not use_streaming:
        # ------------------------- fused (weights resident) -------------------
        if tm is None:
            tm_sel = int(min(tm_cap, max(row_align, tm_fit_fused)))
            # At least 2 row blocks when possible -> both v7x TensorCores get work.
            tm_sel = min(tm_sel, _round_up(pl.cdiv(M, 2), row_align))
            tm_sel = max(row_align, (tm_sel // row_align) * row_align)
        else:
            tm_sel = max(row_align, _round_up(int(tm), row_align))

        grid = (pl.cdiv(M, tm_sel),)
        est_bytes = w_bytes + tm_sel * per_row_fused
        vmem_limit = int(min(vmem_cap - 2 * 1024 * 1024,
                             max(32 * 1024 * 1024, est_bytes + 16 * 1024 * 1024)))
        cost = pl.CostEstimate(
            flops=common_flops, transcendentals=0,
            bytes_accessed=(M * in_dim * cdsize + M * out_dim * odsize
                            + (in_dim * hidden + hidden * out_dim) * cdsize
                            + (hidden + out_dim) * 4))

        const_buf = pl.Buffered(1)   # grid-invariant weights: single-buffer
        out2d = pl.pallas_call(
            _conv_transform_kernel,
            out_shape=jax.ShapeDtypeStruct((M, out_dim), out_dtype),
            grid_spec=pltpu.PrefetchScalarGridSpec(
                num_scalar_prefetch=0,
                grid=grid,
                in_specs=[
                    pl.BlockSpec((tm_sel, in_dim), lambda i: (i, 0)),        # x rows
                    pl.BlockSpec((in_dim, hidden), lambda i: (0, 0),
                                 pipeline_mode=const_buf),                   # W1
                    pl.BlockSpec((1, hidden), lambda i: (0, 0),
                                 pipeline_mode=const_buf),                   # b1 (f32)
                    pl.BlockSpec((hidden, out_dim), lambda i: (0, 0),
                                 pipeline_mode=const_buf),                   # W2
                    pl.BlockSpec((1, out_dim), lambda i: (0, 0),
                                 pipeline_mode=const_buf),                   # b2 (f32)
                ],
                out_specs=pl.BlockSpec((tm_sel, out_dim), lambda i: (i, 0)),
            ),
            compiler_params=pltpu.CompilerParams(
                dimension_semantics=("parallel",),
                vmem_limit_bytes=vmem_limit,
            ),
            cost_estimate=cost,
        )(x2d, w1c, b1f, w2c, b2f)
    else:
        # --------------------- hidden-streaming (K-tiled) ---------------------
        tk = hidden_block if hidden_block is not None else 512
        tk = max(128, _round_up(int(tk), 128))
        tk = min(tk, _round_up(hidden, 128))
        hid_pad = _round_up(hidden, tk)
        if hid_pad != hidden:
            # Zero-pad the hidden dim so padded columns/rows contribute exactly 0.
            w1c = jnp.pad(w1c, ((0, 0), (0, hid_pad - hidden)))
            w2c = jnp.pad(w2c, ((0, hid_pad - hidden), (0, 0)))
            b1f = jnp.pad(b1f, ((0, 0), (0, hid_pad - hidden)))
        n_k = hid_pad // tk

        # Per-k weight slabs are double-buffered; acc + f32 intermediates per row.
        wk_bytes = 2 * (in_v * tk + tk * out_v) * cdsize + 2 * tk * 4 + out_v * 4
        per_row = (2 * in_v * cdsize + 2 * out_v * odsize
                   + out_v * 4 + (tk + out_v) * 4)
        if tm is None:
            tm_fit = (vmem_budget - wk_bytes) // per_row if wk_bytes < vmem_budget else row_align
            tm_sel = int(min(tm_cap, max(row_align, tm_fit)))
            tm_sel = min(tm_sel, _round_up(pl.cdiv(M, 2), row_align))
            tm_sel = max(row_align, (tm_sel // row_align) * row_align)
        else:
            tm_sel = max(row_align, _round_up(int(tm), row_align))

        grid = (pl.cdiv(M, tm_sel), n_k)
        est_bytes = wk_bytes + tm_sel * per_row
        vmem_limit = int(min(vmem_cap - 2 * 1024 * 1024,
                             max(32 * 1024 * 1024, est_bytes + 16 * 1024 * 1024)))
        cost = pl.CostEstimate(
            flops=2 * M * in_dim * hid_pad + 2 * M * hid_pad * out_dim,
            transcendentals=0,
            bytes_accessed=(M * in_dim * cdsize + M * out_dim * odsize
                            + (in_dim * hid_pad + hid_pad * out_dim) * cdsize
                            + (hid_pad + out_dim) * 4))

        out2d = pl.pallas_call(
            _conv_transform_kstream_kernel,
            out_shape=jax.ShapeDtypeStruct((M, out_dim), out_dtype),
            grid_spec=pltpu.PrefetchScalarGridSpec(
                num_scalar_prefetch=0,
                grid=grid,
                in_specs=[
                    pl.BlockSpec((tm_sel, in_dim), lambda i, k: (i, 0)),     # x rows
                    pl.BlockSpec((in_dim, tk), lambda i, k: (0, k)),         # W1[:, k]
                    pl.BlockSpec((1, tk), lambda i, k: (0, k)),              # b1[k] (f32)
                    pl.BlockSpec((tk, out_dim), lambda i, k: (k, 0)),        # W2[k, :]
                    pl.BlockSpec((1, out_dim), lambda i, k: (0, 0),
                                 pipeline_mode=pl.Buffered(1)),              # b2 (f32)
                ],
                out_specs=pl.BlockSpec((tm_sel, out_dim), lambda i, k: (i, 0)),
                scratch_shapes=[pltpu.VMEM((tm_sel, out_dim), jnp.float32)],
            ),
            compiler_params=pltpu.CompilerParams(
                dimension_semantics=("parallel", "arbitrary"),
                vmem_limit_bytes=vmem_limit,
            ),
            cost_estimate=cost,
        )(x2d, w1c, b1f, w2c, b2f)

    if orig_ndim == 3:
        return out2d.reshape(B, S, out_dim)
    return out2d


# --------------------------------------------------------------------------- #
# Demo / correctness checks
# --------------------------------------------------------------------------- #
if __name__ == "__main__":
    B, S = 2, 8
    in_dim, hidden_dim, out_dim = 16, 32, 24

    key = jax.random.PRNGKey(0)
    kx, kw1, kb1, kw2, kb2 = jax.random.split(key, 5)

    x = jax.random.normal(kx, (B, S, in_dim), dtype=jnp.float32)
    # Conv weights squeezed to 2-D and pre-transposed:
    # PyTorch conv1.weight (hidden, in_dim, 1, 1) -> stored here as (in_dim, hidden).
    w1 = jax.random.normal(kw1, (in_dim, hidden_dim), dtype=jnp.float32) / jnp.sqrt(in_dim)
    b1 = jax.random.normal(kb1, (hidden_dim,), dtype=jnp.float32) * 0.5
    w2 = jax.random.normal(kw2, (hidden_dim, out_dim), dtype=jnp.float32) / jnp.sqrt(hidden_dim)
    b2 = jax.random.normal(kb2, (out_dim,), dtype=jnp.float32) * 0.5

    ref = jnp.maximum(x @ w1 + b1, 0.0) @ w2 + b2

    # Tolerances: XLA's / Mosaic's default f32 matmul on TPU may use bf16 MXU
    # passes, so kernel-vs-reference can differ by a few e-3; structural bugs
    # (missing bias, wrong tiling) would be O(0.5)+ here.
    F32_TOL = dict(atol=5e-2, rtol=5e-2)

    # 1) Fused f32 path, 3-D input.
    out = jax.block_until_ready(conv_transform(x, w1, b1, w2, b2))
    assert out.shape == (B, S, out_dim)
    assert jnp.allclose(out, ref, **F32_TOL)

    # 2) 2-D input with M not a multiple of 8 (ragged last row block, no wrapper pad).
    M2 = B * S + 3
    x2 = jax.random.normal(kx, (M2, in_dim), dtype=jnp.float32)
    ref2 = jnp.maximum(x2 @ w1 + b1, 0.0) @ w2 + b2
    out2 = jax.block_until_ready(conv_transform(x2, w1, b1, w2, b2))
    assert out2.shape == (M2, out_dim)
    assert jnp.allclose(out2, ref2, **F32_TOL)

    # 3) bf16 MXU fast path (v6e/v7x): bf16 matmuls, f32 accumulate/bias/ReLU.
    out_bf16 = jax.block_until_ready(
        conv_transform(x, w1, b1, w2, b2, compute_dtype=jnp.bfloat16))
    assert out_bf16.dtype == x.dtype
    assert jnp.allclose(out_bf16, ref, atol=2.5e-1, rtol=2.5e-1)

    # 4) Hidden-streaming (K-tiled accumulator) path, forced with a small block,
    #    with ragged M / non-128 feature dims.
    in3, hid3, out3, M3 = 48, 200, 56, 100
    k3 = jax.random.split(key, 6)
    x3 = jax.random.normal(k3[0], (M3, in3), dtype=jnp.float32)
    w1_3 = jax.random.normal(k3[1], (in3, hid3), dtype=jnp.float32) / jnp.sqrt(in3)
    b1_3 = jax.random.normal(k3[2], (hid3,), dtype=jnp.float32) * 0.5
    w2_3 = jax.random.normal(k3[3], (hid3, out3), dtype=jnp.float32) / jnp.sqrt(hid3)
    b2_3 = jax.random.normal(k3[4], (out3,), dtype=jnp.float32) * 0.5
    ref3 = jnp.maximum(x3 @ w1_3 + b1_3, 0.0) @ w2_3 + b2_3
    out3_arr = jax.block_until_ready(
        conv_transform(x3, w1_3, b1_3, w2_3, b2_3, hidden_block=128))
    assert out3_arr.shape == (M3, out3)
    assert jnp.allclose(out3_arr, ref3, **F32_TOL)

    print("KERNEL_OK")
</pallas_src>

<mosaic_0001>
module attributes {stable_mosaic.version = 11 : i64} {
  func.func @_conv_transform_kernel(%arg0: i32, %arg1: memref<8x16xf32, #tpu.memory_space<vmem>>, %arg2: memref<16x32xf32, #tpu.memory_space<vmem>>, %arg3: memref<1x32xf32, #tpu.memory_space<vmem>>, %arg4: memref<32x24xf32, #tpu.memory_space<vmem>>, %arg5: memref<1x24xf32, #tpu.memory_space<vmem>>, %arg6: memref<8x24xf32, #tpu.memory_space<vmem>>) attributes {dimension_semantics = [#tpu.dimension_semantics<parallel>], iteration_bounds = array<i64: 2>, scalar_prefetch = 0 : i64, scratch_operands = 0 : i64, tpu.core_type = #tpu.core_type<tc>, window_params = [{transform_indices = @transform_0, window_bounds = array<i64: 8, 16>}, {pipeline_mode = #tpu.pipeline_mode<synchronous>, transform_indices = @transform_1, window_bounds = array<i64: 16, 32>}, {pipeline_mode = #tpu.pipeline_mode<synchronous>, transform_indices = @transform_2, window_bounds = array<i64: 1, 32>}, {pipeline_mode = #tpu.pipeline_mode<synchronous>, transform_indices = @transform_3, window_bounds = array<i64: 32, 24>}, {pipeline_mode = #tpu.pipeline_mode<synchronous>, transform_indices = @transform_4, window_bounds = array<i64: 1, 24>}, {transform_indices = @transform_5, window_bounds = array<i64: 8, 24>}]} {
    %c0 = arith.constant 0 : index
    %c0_0 = arith.constant 0 : index
    %0 = vector.load %arg1[%c0, %c0_0] : memref<8x16xf32, #tpu.memory_space<vmem>>, vector<8x16xf32>
    %c0_1 = arith.constant 0 : index
    %c0_2 = arith.constant 0 : index
    %1 = vector.load %arg2[%c0_1, %c0_2] : memref<16x32xf32, #tpu.memory_space<vmem>>, vector<16x32xf32>
    %cst = arith.constant dense<0.000000e+00> : vector<8x32xf32>
    %2 = tpu.matmul %0, %1, %cst {dimension_numbers = #tpu.dot_dimension_numbers<[1], [0], [0], [1], [0, 0, 1, 1], [], []>} : vector<8x16xf32>, vector<16x32xf32>, vector<8x32xf32> -> vector<8x32xf32>
    %c0_3 = arith.constant 0 : index
    %c0_4 = arith.constant 0 : index
    %3 = vector.load %arg3[%c0_3, %c0_4] : memref<1x32xf32, #tpu.memory_space<vmem>>, vector<1x32xf32>
    %4 = vector.broadcast %3 : vector<1x32xf32> to vector<8x32xf32>
    %5 = arith.addf %2, %4 : vector<8x32xf32>
    %cst_5 = arith.constant 0.000000e+00 : f32
    %6 = vector.broadcast %cst_5 : f32 to vector<8x32xf32>
    %7 = arith.maximumf %5, %6 : vector<8x32xf32>
    %c0_6 = arith.constant 0 : index
    %c0_7 = arith.constant 0 : index
    %8 = vector.load %arg4[%c0_6, %c0_7] : memref<32x24xf32, #tpu.memory_space<vmem>>, vector<32x24xf32>
    %cst_8 = arith.constant dense<0.000000e+00> : vector<8x24xf32>
    %9 = tpu.matmul %7, %8, %cst_8 {dimension_numbers = #tpu.dot_dimension_numbers<[1], [0], [0], [1], [0, 0, 1, 1], [], []>} : vector<8x32xf32>, vector<32x24xf32>, vector<8x24xf32> -> vector<8x24xf32>
    %c0_9 = arith.constant 0 : index
    %c0_10 = arith.constant 0 : index
    %10 = vector.load %arg5[%c0_9, %c0_10] : memref<1x24xf32, #tpu.memory_space<vmem>>, vector<1x24xf32>
    %11 = vector.broadcast %10 : vector<1x24xf32> to vector<8x24xf32>
    %12 = arith.addf %9, %11 : vector<8x24xf32>
    %c0_11 = arith.constant 0 : index
    %c0_12 = arith.constant 0 : index
    %13 = vector.load %arg6[%c0_11, %c0_12] : memref<8x24xf32, #tpu.memory_space<vmem>>, vector<8x24xf32>
    tpu.vector_store %arg6[%c0_11, %c0_12], %12 {strides = array<i32>} : memref<8x24xf32, #tpu.memory_space<vmem>>, vector<8x24xf32>,
    return
  }
  func.func @transform_0(%arg0: i32) -> (i32, i32) {
    %c0_i32 = arith.constant 0 : i32
    %c0_i32_0 = arith.constant 0 : i32
    return %arg0, %c0_i32 : i32, i32
  }
  func.func @transform_1(%arg0: i32) -> (i32, i32) {
    %c0_i32 = arith.constant 0 : i32
    %c0_i32_0 = arith.constant 0 : i32
    %c0_i32_1 = arith.constant 0 : i32
    return %c0_i32, %c0_i32_0 : i32, i32
  }
  func.func @transform_2(%arg0: i32) -> (i32, i32) {
    %c0_i32 = arith.constant 0 : i32
    %c0_i32_0 = arith.constant 0 : i32
    %c0_i32_1 = arith.constant 0 : i32
    return %c0_i32, %c0_i32_0 : i32, i32
  }
  func.func @transform_3(%arg0: i32) -> (i32, i32) {
    %c0_i32 = arith.constant 0 : i32
    %c0_i32_0 = arith.constant 0 : i32
    %c0_i32_1 = arith.constant 0 : i32
    return %c0_i32, %c0_i32_0 : i32, i32
  }
  func.func @transform_4(%arg0: i32) -> (i32, i32) {
    %c0_i32 = arith.constant 0 : i32
    %c0_i32_0 = arith.constant 0 : i32
    %c0_i32_1 = arith.constant 0 : i32
    return %c0_i32, %c0_i32_0 : i32, i32
  }
  func.func @transform_5(%arg0: i32) -> (i32, i32) {
    %c0_i32 = arith.constant 0 : i32
    %c0_i32_0 = arith.constant 0 : i32
    return %arg0, %c0_i32 : i32, i32
  }
}

</mosaic_0001>

<bundles_post_ra>
// kernel: tpu_custom_call.1
= control target key start
LH: loop header
LB: loop body
LE: loop exit
PB: predicated region body
PF: predicated region fallthrough
CT: control target
= control target key end

     0   :  { %10 = vsyncpa [#allocation3], 0  ;;  %s778_s0 = inlined_call_operand.vmem [shape: f32[16,16], index: 0, kind: input, shape index: {}]   ;;  %s779_s1 = inlined_call_operand.vmem [shape: f32[16,32], index: 1, kind: input, shape index: {}]   ;;  %s780_s2 = inlined_call_operand.vmem [shape: f32[1,32], index: 2, kind: input, shape index: {}]   ;;  %s781_s3 = inlined_call_operand.vmem [shape: f32[32,24], index: 3, kind: input, shape index: {}]   ;;  %s782_s4 = inlined_call_operand.vmem [shape: f32[1,24], index: 4, kind: input, shape index: {}]   ;;  %s783_s5 = inlined_call_operand.hbm [shape: f32[16,24], index: 5, kind: output, shape index: {}]  }
   0x1   :  { %12 = vsyncpa [#allocation3 + $0x1], 0  ;;  %s654_s18 = smov 0   ;;  %s656_s19 = smov 0  }
   0x2   :  { %s658_s20 = smov 0   ;;  %s660_s21 = smov 0  }
   0x3 LB: > { %s675_s22 = sadd.s32 4294967295, %s618_s21   ;;  %s465_s23 = sadd.s32 4294967294, %s618_s21   ;;  %s618_s21 = sphi %s660_s21, %s789_s21   ;;  %s614_s20 = sphi %s658_s20, %s788_s20   ;;  %s610_s19 = sphi %s656_s19, %s787_s19   ;;  %s606_s18 = sphi %s654_s18, %s786_s18  }
   0x4   : > { %s679_s24 = sadd.s32 1, %s618_s21   ;;  %s135_s25 = sadd.s32 1, %s614_s20 }
   0x5   : > { %s132_s26 = ssub.s32 %s618_s21, %s679_s24  ;;  %p145_p0 = scmp.ne.s32.totalorder %s614_s20, %s610_s19 }
   0x6   : > { %p133_p1 = scmp.eq.s32.totalorder %s132_s26, 0  ;;  %p146_p2 = scmp.eq.s32.totalorder %s675_s22, 1 }
   0x7   : > { %p151_p3 = scmp.ne.s32.totalorder %s610_s19, %s606_s18  ;;  %p152_p4 = scmp.eq.s32.totalorder %s465_s23, 1 }
   0x8   : > { %s690_s27 = scalar_select %p133_p1, %s614_s20, %s135_s25  }
   0x9   : > { %p692_p5 = por %p146_p2, %p145_p0  ;;  %p696_p6 = por %p152_p4, %p151_p3 }
   0xa   : > { %p468_p7 = scmp.ge.s32.totalorder %s618_s21, 1  ;;  %p189_p8 = scmp.lt.s32.totalorder %s618_s21, 3 }
   0xc   : > { %p190_p9 = pnand %p468_p7, %p189_p8 }
   0xd   : > { %v221_v0 = vld [vmem:[%s779_s1] sm:$0xff] (!%p190_p9)  ;;  %v222_v1 = vld [vmem:[%s779_s1 + $0x8] sm:$0xff] (!%p190_p9)  ;;  %p216_p10 = scmp.lt.s32.totalorder (!%p190_p9), %s675_s22, 1  ;;  %v620_v2 = vmov (!%p190_p9), 0.0|0.0   ;;  %vm621_vm0 = vmmov (!%p190_p9), 0   ;;  %v622_v4 = vmov (!%p190_p9), 0.0  }
   0xe   : > { %193 = sbr.rel (%p190_p9) target bundleno = 470 (0x1d6), region = 40  ;;  %505 = vmatprep.subr.bf16.mxu0 (!%p190_p9), %v620_v2  ;;  %v506_v3 = vpack.c.bf16 (!%p190_p9), %v222_v1, %v221_v0  ;;  %491 = vmatprep.mubr.msk.f32.mxu0 (!%p190_p9), %vm621_vm0, %v622_v4  ;;  %v305_v5 = vld [vmem:[%s781_s3] sm:$0xff] (!%p190_p9)  ;;  %v306_v6 = vld [vmem:[%s781_s3 + $0x8] sm:$0xff] (!%p190_p9)  ;;  %vm230_vm1 = vcmask (!%p190_p9), 130048   ;;  %v307_v9 = vld [vmem:[%s781_s3 + $0x10] sm:$0xff] (!%p190_p9)  ;;  %vm316_vm2 = vcmask (!%p190_p9), 261120  }
   0xf   : > { %508 = vmatprep.subr.bf16.mxu1 (!%p190_p9), %v620_v2  ;;  %v509_v7 = vpack.c.bf16 (!%p190_p9), %v306_v6, %v305_v5  ;;  %502 = vmatprep.mubr.msk.f32.mxu1 (!%p190_p9), %vm621_vm0, %v622_v4  ;;  %v308_v10 = vld [vmem:[%s781_s3 + $0x18] sm:$0xff] (!%p190_p9)  ;;  %v471_v12 = vld [vmem:[%s780_s2] ss:$0 sm:$0xff] (!%p190_p9)  ;;  %s213_s8 = sand.u32 (!%p190_p9), 1, %s610_s19   ;;  %s476_s12 = sshll.u32 (!%p190_p9), %s675_s22, 7  ;;  %vm390_vm3 = vcmask (!%p190_p9), 195584  }
  0x10   : > { %507 = vmatpush3.bf16.msra.mxu0 (!%p190_p9), %v506_v3  ;;  %v512_v11 = vpack.c.bf16 (!%p190_p9), %v308_v10, %v307_v9  ;;  %s469_s9 = sshll.u32 (!%p190_p9), %s213_s8, 3  ;;  %v473_v17 = vld [vmem:[%s782_s4] ss:$0 sm:$0xff] (!%p190_p9)  ;;  %s393_s23 = scalar_lea.sflag (!%p190_p9), [#allocation3], %s213_s8 }
  0x11   : > { %510 = vmatpush3.bf16.msra.mxu1 (!%p190_p9), %v509_v7 }
  0x12   : > { %511 = vmatprep.subr.bf16.mxu1 (!%p190_p9), %v620_v2 }
  0x15   : > { %s217_s13 = scalar_select %p216_p10, %s675_s22, 1  ;;  %513 = vmatpush3.bf16.msra.mxu1 %v512_v11 }
  0x16   : > { %s623_s22 = smov [#allocation2]  }
  0x17   : > { %s470_s14 = sshll.u32 %s217_s13, 3  ;;  %s215_s13 = scalar_lea.vmem [#allocation2], %s469_s9 }
  0x18   : > { %s219_s17 = scalar_lea.vmem %s778_s0, %s470_s14  ;;  %s406_s14 = sshll.u32 %s215_s13, 4  ;;  %s738_s14 = int_to_ptr.vmem [resolvable:$true] %s406_s14 }
  0x19   : > { %v220_v8 = vld [vmem:[%s219_s17] sm:$0xff]  ;;  %s736_s17 = scalar_lea.hbm %s783_s5, %s476_s12  ;;  %s556_s25 = scalar_lea.vmem %s738_s14, 128 }
  0x1a   : > { %492 = vmatmul.mubr.msk.f32.vlgmr.msra.gmra.mrb[0].mxu0 %vm230_vm1, %v220_v8  ;;  %p557_p11 = scmp.ne.s32.totalorder %s738_s14, %s556_s25  ;;  %s560_s26 = sshll.u32 %s623_s22, 4  ;;  %s561_s26 = int_to_ptr.vmem [resolvable:$false] %s560_s26 }
  0x1b   : > { %s562_s30 = scalar_lea.vmem %s561_s26, 256  ;;  %p563_p0 = scmp.lt.s32.totalorder %s738_s14, %s561_s26 }
  0x1c   : > { %p558_p12 = pnand %p557_p11, %p692_p5  ;;  %p564_p1 = scmp.lt.s32.totalorder %s562_s30, %s556_s25 }
  0x1e   : > { %p559_p13 = pneg %p558_p12  ;;  %p565_p2 = por %p564_p1, %p563_p0 }
  0x20   : > { %p566_p3 = pnand %p565_p2, %p559_p13 }
  0xed   : > { %v300_v13 = vpop.f32.mrb[0].mxu0 }
  0xee   : > { %v301_v14 = vadd.f32 %v471_v12, %v300_v13  ;;  %v493_v15 = vpop.f32.mrb[1].mxu0 }
  0xf0   : > { %v304_v16 = vmax.f32 %v301_v14, 0.0 }
  0xf2   : > { %503 = vmatmul.mubr.msk.f32.vlgmr.msra.gmra.mrb[0].mxu1 %vm316_vm2, %v304_v16 }
 0x1c5   : > { %v386_v18 = vpop.f32.mrb[0].mxu1 }
 0x1c6   : > { %v387_v19 = vadd.f32 %v473_v17, %v386_v18  ;;  %v504_v20 = vpop.f32.mrb[1].mxu1 }
 0x1c8   : > { %391 = vst.msk [vmem:[%s215_s13] sm:$0xff] %vm390_vm3, %v387_v19 }
 0x1c9   : > { %569 = shalt.err (!%p566_p3)
}
 0x1ca   : > { %s570_s6 = scalar_lea.hbm %s736_s17, 128  ;;  %s574_s9 = scalar_lea.hbm %s783_s5, 256 }
 0x1cb   : > { %p571_p4 = scmp.ne.s32.totalorder %s736_s17, %s570_s6  ;;  %p575_p9 = scmp.lt.u32.totalorder %s736_s17, %s783_s5 }
 0x1cc   : > { %p576_p10 = scmp.lt.u32.totalorder %s574_s9, %s570_s6  ;;  %p578_p12 = scmp.lt.u32.totalorder %s570_s6, %s736_s17 }
 0x1cd   : > { %p572_p7 = pnand %p571_p4, %p692_p5 }
 0x1ce   : > { %p577_p11 = por %p576_p10, %p575_p9 }
 0x1cf   : > { %p573_p8 = pneg %p572_p7 }
 0x1d0   : > { %p579_p13 = por %p578_p12, %p577_p11 }
 0x1d2   : > { %p580_p0 = pnand %p579_p13, %p573_p8 }
 0x1d4   : > { %583 = shalt.err (!%p580_p0)
}
 0x1d5   : > { %514 = dma.vmem_to_hbm [thread:$0]  (%p692_p5), %s738_s14, 128, %s736_s17, %s393_s23  }
 0x1d6 PF: > { %p520_p1 = scmp.ge.s32.totalorder %s618_s21, 2  ;;  %s418_s12 = sand.u32 1, %s606_s18  }
 0x1d7   : > { %s419_s13 = scalar_lea.sflag [#allocation3], %s418_s12 }
 0x1d8   : > { %p517_p2 = pnand %p520_p1, %p696_p6 }
 0x1da   : > { %601 = dma.done.wait (!%p517_p2), %s419_s13, 128  }
 0x1db   : > { %603 = vsyncadd (!%p517_p2), %s419_s13, 4294967168  ;;  %p15_p3 = scmp.ge.s32.totalorder %s679_s24, 4   ;;  %s786_s18 = smov %s610_s19 }
 0x1dc   : > { %s787_s19 = smov %s614_s20  ;;  %s788_s20 = smov %s690_s27 }
 0x1dd   : > { %s789_s21 = smov %s679_s24  ;;  %17 = sbr.rel (!%p15_p3) target bundleno = 3 (0x3), region = 75 }
 0x1e4   :  { %424 = vsyncpa [#allocation3], 1 }
 0x1e5   :  { %426 = vsyncpa [#allocation3 + $0x1], 1 }

</bundles_post_ra>
